<compile_context>
chip_gen: v5e
topology: v5e:2x2
jax: 0.10.0
libtpu: 0.0.40
codegen_flags: <defaults>
</compile_context>

<pallas_src>
import jax
import jax.numpy as jnp
from jax.experimental import pallas as pl
from jax.experimental.pallas import tpu as pltpu


def _pooler_start_logits_kernel(x_ref, wt_ref, b_ref, o_ref):
    # x_ref : [TM, H]  current tile of activations
    # wt_ref: [H, C]   transposed weight (resident across all grid steps)
    # b_ref : [1, C]   bias              (resident across all grid steps)
    # o_ref : [TM, C]
    acc = jnp.dot(x_ref[...], wt_ref[...], preferred_element_type=jnp.float32)
    o_ref[...] = (acc + b_ref[...].astype(jnp.float32)).astype(o_ref.dtype)


def _choose_tm(M, dtype):
    """Pick an M-tile size: big enough to amortize per-step overhead (~0.35us)
    and hit the HBM roofline, multiple of the sublane packing for `dtype`."""
    tm = 512                      # multiple of 8 (f32), 16 (bf16), 32 (int8)
    if M <= tm:
        return M                  # single tile == full array dim: always legal
    return tm


def pooler_start_logits(hidden_states, weight, bias):
    """hidden_states: [B, S, H]; weight: [C, H]; bias: [C] -> [B, S, C]."""
    B, S, H = hidden_states.shape
    C = weight.shape[0]
    M = B * S

    x2d = hidden_states.reshape(M, H)
    wt = weight.T                      # [H, C]
    b2d = bias.reshape(1, C)           # [1, C]

    tm = _choose_tm(M, x2d.dtype)
    grid = (pl.cdiv(M, tm),)

    cost = pl.CostEstimate(
        flops=2 * M * H * C,
        transcendentals=0,
        bytes_accessed=(M * H * x2d.dtype.itemsize
                        + H * C * wt.dtype.itemsize
                        + C * b2d.dtype.itemsize
                        + M * C * hidden_states.dtype.itemsize),
    )

    out = pl.pallas_call(
        _pooler_start_logits_kernel,
        out_shape=jax.ShapeDtypeStruct((M, C), hidden_states.dtype),
        grid_spec=pltpu.PrefetchScalarGridSpec(
            num_scalar_prefetch=0,
            grid=grid,
            in_specs=[
                # Streamed activations: one TM-row tile per grid step.
                pl.BlockSpec((tm, H), lambda i: (i, 0)),
                # Weight & bias: constant block index -> stay resident in VMEM.
                pl.BlockSpec((H, C), lambda i: (0, 0)),
                pl.BlockSpec((1, C), lambda i: (0, 0)),
            ],
            out_specs=pl.BlockSpec((tm, C), lambda i: (i, 0)),
        ),
        compiler_params=pltpu.CompilerParams(
            dimension_semantics=("parallel",)),
        cost_estimate=cost,
    )(x2d, wt, b2d)

    return out.reshape(B, S, C)


if __name__ == "__main__":
    # Small shapes consistent with the module's forward:
    # hidden_states [batch=2, seq=8, hidden=32], num_classes=4.
    batch, seq, hidden_size, num_classes = 2, 8, 32, 4

    key = jax.random.PRNGKey(0)
    k_x, k_w, k_b = jax.random.split(key, 3)

    hidden_states = jax.random.normal(k_x, (batch, seq, hidden_size),
                                      dtype=jnp.float32)
    # Deterministic "init" of nn.Linear(hidden_size, num_classes) params.
    weight = jax.random.normal(k_w, (num_classes, hidden_size),
                               dtype=jnp.float32) * 0.02
    bias = jax.random.normal(k_b, (num_classes,), dtype=jnp.float32) * 0.02

    out = pooler_start_logits(hidden_states, weight, bias)
    jax.block_until_ready(out)

    # Reference check against plain JAX (same math as torch's nn.Linear).
    ref = hidden_states @ weight.T + bias
    assert out.shape == (batch, seq, num_classes)
    assert jnp.allclose(out, ref, atol=1e-5, rtol=1e-5)

    print("KERNEL_OK")
</pallas_src>

<mosaic_0001>
module attributes {stable_mosaic.version = 11 : i64} {
  func.func @_pooler_start_logits_kernel(%arg0: i32, %arg1: memref<16x32xf32, #tpu.memory_space<vmem>>, %arg2: memref<32x4xf32, #tpu.memory_space<vmem>>, %arg3: memref<1x4xf32, #tpu.memory_space<vmem>>, %arg4: memref<16x4xf32, #tpu.memory_space<vmem>>) attributes {dimension_semantics = [#tpu.dimension_semantics<parallel>], iteration_bounds = array<i64: 1>, scalar_prefetch = 0 : i64, scratch_operands = 0 : i64, tpu.core_type = #tpu.core_type<tc>, window_params = [{transform_indices = @transform_0, window_bounds = array<i64: 16, 32>}, {pipeline_mode = #tpu.pipeline_mode<synchronous>, transform_indices = @transform_1, window_bounds = array<i64: 32, 4>}, {pipeline_mode = #tpu.pipeline_mode<synchronous>, transform_indices = @transform_2, window_bounds = array<i64: 1, 4>}, {transform_indices = @transform_3, window_bounds = array<i64: 16, 4>}]} {
    %c0 = arith.constant 0 : index
    %c0_0 = arith.constant 0 : index
    %0 = vector.load %arg1[%c0, %c0_0] : memref<16x32xf32, #tpu.memory_space<vmem>>, vector<16x32xf32>
    %c0_1 = arith.constant 0 : index
    %c0_2 = arith.constant 0 : index
    %1 = vector.load %arg2[%c0_1, %c0_2] : memref<32x4xf32, #tpu.memory_space<vmem>>, vector<32x4xf32>
    %cst = arith.constant dense<0.000000e+00> : vector<16x4xf32>
    %2 = tpu.matmul %0, %1, %cst {dimension_numbers = #tpu.dot_dimension_numbers<[1], [0], [0], [1], [0, 0, 1, 1], [], []>} : vector<16x32xf32>, vector<32x4xf32>, vector<16x4xf32> -> vector<16x4xf32>
    %c0_3 = arith.constant 0 : index
    %c0_4 = arith.constant 0 : index
    %3 = vector.load %arg3[%c0_3, %c0_4] : memref<1x4xf32, #tpu.memory_space<vmem>>, vector<1x4xf32>
    %4 = vector.broadcast %3 : vector<1x4xf32> to vector<16x4xf32>
    %5 = arith.addf %2, %4 : vector<16x4xf32>
    %c0_5 = arith.constant 0 : index
    %c0_6 = arith.constant 0 : index
    %6 = vector.load %arg4[%c0_5, %c0_6] : memref<16x4xf32, #tpu.memory_space<vmem>>, vector<16x4xf32>
    tpu.vector_store %arg4[%c0_5, %c0_6], %5 {strides = array<i32>} : memref<16x4xf32, #tpu.memory_space<vmem>>, vector<16x4xf32>,
    return
  }
  func.func @transform_0(%arg0: i32) -> (i32, i32) {
    %c0_i32 = arith.constant 0 : i32
    %c0_i32_0 = arith.constant 0 : i32
    return %arg0, %c0_i32 : i32, i32
  }
  func.func @transform_1(%arg0: i32) -> (i32, i32) {
    %c0_i32 = arith.constant 0 : i32
    %c0_i32_0 = arith.constant 0 : i32
    %c0_i32_1 = arith.constant 0 : i32
    return %c0_i32, %c0_i32_0 : i32, i32
  }
  func.func @transform_2(%arg0: i32) -> (i32, i32) {
    %c0_i32 = arith.constant 0 : i32
    %c0_i32_0 = arith.constant 0 : i32
    %c0_i32_1 = arith.constant 0 : i32
    return %c0_i32, %c0_i32_0 : i32, i32
  }
  func.func @transform_3(%arg0: i32) -> (i32, i32) {
    %c0_i32 = arith.constant 0 : i32
    %c0_i32_0 = arith.constant 0 : i32
    return %arg0, %c0_i32 : i32, i32
  }
}

</mosaic_0001>

<bundles_post_ra>
// kernel: tpu_custom_call.1
= control target key start
LH: loop header
LB: loop body
LE: loop exit
PB: predicated region body
PF: predicated region fallthrough
CT: control target
= control target key end

     0   :  { %vm24_vm0 = vcmask 261120   ;;  %vm54_vm1 = vcmask 31744   ;;  %s115_s1 = inlined_call_operand.vmem [shape: f32[32,4], index: 1, kind: input, shape index: {}]   ;;  %s116_s2 = inlined_call_operand.vmem [shape: f32[1,4], index: 2, kind: input, shape index: {}]   ;;  %s117_s0 = inlined_call_operand.vmem [shape: f32[16,32], index: 0, kind: input, shape index: {}]   ;;  %s118_s3 = inlined_call_operand.vmem [shape: f32[16,4], index: 3, kind: output, shape index: {}]  }
   0x1   :  { %v19_v0 = vld [vmem:[%s115_s1 + $0x18] sm:$0xff]  ;;  %v18_v1 = vld [vmem:[%s115_s1 + $0x10] sm:$0xff]  ;;  %v17_v2 = vld [vmem:[%s115_s1 + $0x8] sm:$0xff] }
   0x2   :  { %43 = vmatpush.msra.mxu0 %v19_v0  ;;  %63 = vmatpush.msra.mxu1 %v19_v0  ;;  %v16_v3 = vld [vmem:[%s115_s1] sm:$0xff]  ;;  %v15_v5 = vld [vmem:[%s117_s0 + $0x8] sm:$0xff] }
   0x3   :  { %v14_v4 = vld [vmem:[%s117_s0] sm:$0xff] }
   0x4   :  { %44 = vmatpush.msra.mxu0 %v18_v1  ;;  %64 = vmatpush.msra.mxu1 %v18_v1  ;;  %v67_v6 = vld [vmem:[%s116_s2] ss:$0 sm:$0xff] }
   0x6   :  { %45 = vmatpush.msra.mxu0 %v17_v2  ;;  %65 = vmatpush.msra.mxu1 %v17_v2 }
   0x8   :  { %46 = vmatpush.msra.mxu0 %v16_v3  ;;  %66 = vmatpush.msra.mxu1 %v16_v3 }
   0x9   :  { %61 = vmatmul.msk.f32.vlgmr.msra.gmra.mxu0 %vm24_vm0, %v14_v4  ;;  %62 = vmatmul.msk.f32.vlgmr.msra.gmra.mxu1 %vm24_vm0, %v15_v5 }
  0x86   :  { %v48_v7 = vpop.f32.mrf.mxu0  ;;  %v51_v8 = vpop.f32.mrf.mxu1 }
  0x87   :  { %v49_v9 = vadd.f32 %v67_v6, %v48_v7  ;;  %v52_v10 = vadd.f32 %v67_v6, %v51_v8 }
  0x89   :  { %55 = vst.msk [vmem:[%s118_s3] sm:$0xff] %vm54_vm1, %v49_v9 }
  0x8a   :  { %56 = vst.msk [vmem:[%s118_s3 + $0x8] sm:$0xff] %vm54_vm1, %v52_v10 }

</bundles_post_ra>
